<compile_context>
chip_gen: v7x
topology: tpu7x:2x2x1
jax: 0.10.0
libtpu: 0.0.40
codegen_flags: <defaults>
</compile_context>

<pallas_src>
import math

import jax
import jax.numpy as jnp
import numpy as np
from jax.experimental import pallas as pl
from jax.experimental.pallas import tpu as pltpu

EPS = 1e-5


# ---------------------------------------------------------------------------
# Kernels.  In-kernel layout: channels on sublanes, (batch*length) on lanes.
# ---------------------------------------------------------------------------
def _shift_left(z):
    """result[:, p] = z[:, p + 1] (lane rotate; wrap lands on invalid columns)."""
    lanes = z.shape[1]
    return pltpu.roll(z, shift=lanes - 1, axis=1)


def _mm(w, x):
    return jnp.dot(w, x, preferred_element_type=jnp.float32)


def _stats1_kernel(x_ref, mask_ref, w1_ref, w40_ref, w41_ref, out_ref):
    """Partial sum / sum-of-squares for bn1 (conv1) and bn4res (conv4res)."""
    x = x_ref[...]                                   # (Cin, lanes)
    mask = mask_ref[...]                             # (1, lanes): valid k=2 columns

    z1 = _mm(w1_ref[...], x)                         # conv1 (k=1), bias cancels in BN
    z4 = _mm(w40_ref[...], x) + _shift_left(_mm(w41_ref[...], x))   # conv4res (k=2)
    z4 = z4 * mask                                   # zero invalid / padded columns
    # padded-batch columns of x are exactly zero -> z1 contributes nothing there.

    s1 = jnp.sum(z1, axis=1, keepdims=True)
    ss1 = jnp.sum(z1 * z1, axis=1, keepdims=True)
    s4 = jnp.sum(z4, axis=1, keepdims=True)
    ss4 = jnp.sum(z4 * z4, axis=1, keepdims=True)
    out_ref[0] = jnp.concatenate([s1, ss1, s4, ss4], axis=1)          # (Cout, 4)


def _stats2_kernel(x_ref, mask_ref, w1s_ref, sh1_ref, w20_ref, w21_ref, out_ref):
    """Partial sum / sum-of-squares for bn2 (conv2 over relu(bn1(conv1 X)))."""
    x = x_ref[...]
    mask = mask_ref[...]

    # h = relu(bn1(conv1 x)) with the bn1 scale pre-folded into w1s
    h = jnp.maximum(_mm(w1s_ref[...], x) + sh1_ref[...], 0.0)        # (Cout, lanes)
    z2 = _mm(w20_ref[...], h) + _shift_left(_mm(w21_ref[...], h))    # conv2 (k=2)
    z2 = z2 * mask

    s2 = jnp.sum(z2, axis=1, keepdims=True)
    ss2 = jnp.sum(z2 * z2, axis=1, keepdims=True)
    out_ref[0] = jnp.concatenate([s2, ss2], axis=1)                   # (Cout, 2)


def _apply_kernel(x_ref, w1s_ref, sh1_ref, w20s_ref, w21s_ref, sh2_ref,
                  w40s_ref, w41s_ref, sh4_ref, out_ref):
    """Apply both branches and the residual add; lane-dense (Cout, TB*L) output."""
    x = x_ref[...]

    h = jnp.maximum(_mm(w1s_ref[...], x) + sh1_ref[...], 0.0)                  # relu(bn1(conv1))
    main = jnp.maximum(
        _mm(w20s_ref[...], h) + _shift_left(_mm(w21s_ref[...], h)) + sh2_ref[...],
        0.0)                                                                    # relu(bn2(conv2))
    short = (_mm(w40s_ref[...], x) + _shift_left(_mm(w41s_ref[...], x))
             + sh4_ref[...])                                                    # bn4res(conv4res)

    out_ref[...] = (short + main).astype(out_ref.dtype)


# ---------------------------------------------------------------------------
# Wrapper.
# ---------------------------------------------------------------------------
def _plan_tiling(N, L, target_lanes):
    """Batch tile TB: big lane extent, TB*L % 128 == 0 whenever multi-block."""
    step = 128 // math.gcd(L, 128)            # smallest TB making TB*L a 128-multiple
    tb = max(step, (max(target_lanes, L) // L) // step * step)
    if tb >= N:
        return N, 1                           # single block == full extent
    return tb, -(-N // tb)


def _bn_scale_shift(s, ss, count, gamma, beta):
    """Per-channel BN affine from (bias-free) sums; (Cout,) -> (Cout,), (Cout,)."""
    mean = s / count
    var = ss / count - mean * mean            # biased variance (training-mode BN)
    scale = gamma * jax.lax.rsqrt(var + EPS)
    return scale, beta - scale * mean


def residual_forward(x_ncl, params, *, target_lanes=2048):
    """x_ncl: (N, Cin, L) float32 -> (N, Cout, L-1) float32."""
    N, Cin, L = x_ncl.shape
    Cout = params["conv1_w"].shape[0]
    T = L - 1
    TB, n_blocks = _plan_tiling(N, L, target_lanes)
    N_pad = TB * n_blocks
    lanes = TB * L

    # ---- layout plumbing (XLA, once): NCL -> channels x (batch*length) ----
    xp = x_ncl if N_pad == N else jnp.pad(x_ncl, ((0, N_pad - N), (0, 0), (0, 0)))
    x_flat = jnp.transpose(xp, (1, 0, 2)).reshape(Cin, N_pad * L)

    # validity of k=2 conv output columns: real batch AND t < L-1
    valid = (jnp.arange(N_pad)[:, None] < N) & (jnp.arange(L)[None, :] < T)
    mask = valid.reshape(1, N_pad * L).astype(jnp.float32)

    # per-tap conv weight matrices (biases cancel under training-mode BN)
    w1 = params["conv1_w"][:, :, 0]                                   # (Cout, Cin)
    w20, w21 = params["conv2_w"][:, :, 0], params["conv2_w"][:, :, 1]  # (Cout, Cout)
    w40, w41 = params["conv4_w"][:, :, 0], params["conv4_w"][:, :, 1]  # (Cout, Cin)

    x_spec = pl.BlockSpec((Cin, lanes), lambda i: (0, i))
    m_spec = pl.BlockSpec((1, lanes), lambda i: (0, i))
    const = lambda shape: pl.BlockSpec(shape, lambda i: (0, 0))        # fetched once
    cp = pltpu.CompilerParams(dimension_semantics=("parallel",))

    # ---- pass 1: stats for bn1 / bn4res (per-block partials, reduced in XLA) ----
    part1 = pl.pallas_call(
        _stats1_kernel,
        out_shape=jax.ShapeDtypeStruct((n_blocks, Cout, 4), jnp.float32),
        grid_spec=pltpu.PrefetchScalarGridSpec(
            num_scalar_prefetch=0,
            grid=(n_blocks,),
            in_specs=[x_spec, m_spec, const((Cout, Cin)),
                      const((Cout, Cin)), const((Cout, Cin))],
            out_specs=pl.BlockSpec((1, Cout, 4), lambda i: (i, 0, 0)),
        ),
        compiler_params=cp,
    )(x_flat, mask, w1, w40, w41)

    sums1 = jnp.sum(part1, axis=0)                                     # (Cout, 4)
    cnt1, cnt2 = float(N * L), float(N * T)
    scale1, shift1 = _bn_scale_shift(sums1[:, 0], sums1[:, 1], cnt1,
                                     params["bn1_g"], params["bn1_b"])
    scale4, shift4 = _bn_scale_shift(sums1[:, 2], sums1[:, 3], cnt2,
                                     params["bn4_g"], params["bn4_b"])

    w1s = scale1[:, None] * w1                       # fold bn1 scale into conv1
    sh1 = shift1[:, None]                            # (Cout, 1)

    # ---- pass 2: stats for bn2 ----
    part2 = pl.pallas_call(
        _stats2_kernel,
        out_shape=jax.ShapeDtypeStruct((n_blocks, Cout, 2), jnp.float32),
        grid_spec=pltpu.PrefetchScalarGridSpec(
            num_scalar_prefetch=0,
            grid=(n_blocks,),
            in_specs=[x_spec, m_spec, const((Cout, Cin)), const((Cout, 1)),
                      const((Cout, Cout)), const((Cout, Cout))],
            out_specs=pl.BlockSpec((1, Cout, 2), lambda i: (i, 0, 0)),
        ),
        compiler_params=cp,
    )(x_flat, mask, w1s, sh1, w20, w21)

    sums2 = jnp.sum(part2, axis=0)                                     # (Cout, 2)
    scale2, shift2 = _bn_scale_shift(sums2[:, 0], sums2[:, 1], cnt2,
                                     params["bn2_g"], params["bn2_b"])

    w20s, w21s = scale2[:, None] * w20, scale2[:, None] * w21
    w40s, w41s = scale4[:, None] * w40, scale4[:, None] * w41
    sh2, sh4 = shift2[:, None], shift4[:, None]

    # ---- pass 3: apply both branches + residual add (lane-dense output) ----
    out_flat = pl.pallas_call(
        _apply_kernel,
        out_shape=jax.ShapeDtypeStruct((Cout, N_pad * L), jnp.float32),
        grid_spec=pltpu.PrefetchScalarGridSpec(
            num_scalar_prefetch=0,
            grid=(n_blocks,),
            in_specs=[x_spec,
                      const((Cout, Cin)), const((Cout, 1)),
                      const((Cout, Cout)), const((Cout, Cout)), const((Cout, 1)),
                      const((Cout, Cin)), const((Cout, Cin)), const((Cout, 1))],
            out_specs=pl.BlockSpec((Cout, lanes), lambda i: (0, i)),
        ),
        compiler_params=cp,
    )(x_flat, w1s, sh1, w20s, w21s, sh2, w40s, w41s, sh4)

    # ---- layout plumbing back to (N, Cout, L-1) ----
    out = out_flat.reshape(Cout, N_pad, L)[:, :N, :T]
    return jnp.transpose(out, (1, 0, 2))


# ---------------------------------------------------------------------------
# Parameter init (mirrors nn.Conv1d / nn.BatchNorm1d defaults) and JAX reference.
# ---------------------------------------------------------------------------
def init_params(key, in_channels, out_channels):
    ks = jax.random.split(key, 6)

    def conv_init(kw, kb, cout, cin, ksz):
        bound = 1.0 / np.sqrt(cin * ksz)
        w = jax.random.uniform(kw, (cout, cin, ksz), jnp.float32, -bound, bound)
        b = jax.random.uniform(kb, (cout,), jnp.float32, -bound, bound)
        return w, b

    conv1_w, conv1_b = conv_init(ks[0], ks[1], out_channels, in_channels, 1)
    conv2_w, conv2_b = conv_init(ks[2], ks[3], out_channels, out_channels, 2)
    conv4_w, conv4_b = conv_init(ks[4], ks[5], out_channels, in_channels, 2)

    ones = jnp.ones((out_channels,), jnp.float32)
    zeros = jnp.zeros((out_channels,), jnp.float32)
    return dict(
        conv1_w=conv1_w, conv1_b=conv1_b,
        conv2_w=conv2_w, conv2_b=conv2_b,
        conv4_w=conv4_w, conv4_b=conv4_b,
        bn1_g=ones, bn1_b=zeros,
        bn2_g=ones, bn2_b=zeros,
        bn4_g=ones, bn4_b=zeros,
    )


def reference_forward(x_ncl, p):
    """Pure-JAX reference mirroring the PyTorch math (with conv biases)."""
    def conv_k1(x, w, b):
        return jnp.einsum("ncl,oc->nol", x, w[:, :, 0]) + b[None, :, None]

    def conv_k2(x, w, b):
        return (jnp.einsum("ncl,oc->nol", x[:, :, :-1], w[:, :, 0])
                + jnp.einsum("ncl,oc->nol", x[:, :, 1:], w[:, :, 1])
                + b[None, :, None])

    def bn(x, g, bt):      # training-mode batch norm (biased variance)
        mean = jnp.mean(x, axis=(0, 2), keepdims=True)
        var = jnp.mean((x - mean) ** 2, axis=(0, 2), keepdims=True)
        return (g[None, :, None] * (x - mean) * jax.lax.rsqrt(var + EPS)
                + bt[None, :, None])

    y1 = bn(conv_k2(x_ncl, p["conv4_w"], p["conv4_b"]), p["bn4_g"], p["bn4_b"])
    y2 = jax.nn.relu(bn(conv_k1(x_ncl, p["conv1_w"], p["conv1_b"]),
                        p["bn1_g"], p["bn1_b"]))
    y2 = jax.nn.relu(bn(conv_k2(y2, p["conv2_w"], p["conv2_b"]),
                        p["bn2_g"], p["bn2_b"]))
    return y1 + y2


if __name__ == "__main__":
    key = jax.random.PRNGKey(0)

    # (N, Cin, Cout, L, target_lanes): first config = single block;
    # second forces multi-block + batch padding to exercise the general path.
    for (N, Cin, Cout, L, tgt) in [(2, 4, 8, 16, 2048),
                                   (10, 4, 8, 16, 128)]:
        k_x, k_p, key = jax.random.split(key, 3)
        x = jax.random.normal(k_x, (N, Cin, L), jnp.float32)
        params = init_params(k_p, Cin, Cout)

        out = jax.block_until_ready(residual_forward(x, params, target_lanes=tgt))
        ref = reference_forward(x, params)

        assert out.shape == (N, Cout, L - 1), out.shape
        np.testing.assert_allclose(np.asarray(out), np.asarray(ref),
                                   rtol=1e-4, atol=1e-4)

    print("KERNEL_OK")
</pallas_src>

<mosaic_0001>
module attributes {stable_mosaic.version = 11 : i64} {
  func.func @_stats1_kernel(%arg0: i32, %arg1: memref<4x32xf32, #tpu.memory_space<vmem>>, %arg2: memref<1x32xf32, #tpu.memory_space<vmem>>, %arg3: memref<8x4xf32, #tpu.memory_space<vmem>>, %arg4: memref<8x4xf32, #tpu.memory_space<vmem>>, %arg5: memref<8x4xf32, #tpu.memory_space<vmem>>, %arg6: memref<1x8x4xf32, #tpu.memory_space<vmem>>) attributes {dimension_semantics = [#tpu.dimension_semantics<parallel>], iteration_bounds = array<i64: 1>, scalar_prefetch = 0 : i64, scratch_operands = 0 : i64, tpu.core_type = #tpu.core_type<tc>, window_params = [{transform_indices = @transform_0, window_bounds = array<i64: 4, 32>}, {transform_indices = @transform_1, window_bounds = array<i64: 1, 32>}, {pipeline_mode = #tpu.pipeline_mode<synchronous>, transform_indices = @transform_2, window_bounds = array<i64: 8, 4>}, {pipeline_mode = #tpu.pipeline_mode<synchronous>, transform_indices = @transform_3, window_bounds = array<i64: 8, 4>}, {pipeline_mode = #tpu.pipeline_mode<synchronous>, transform_indices = @transform_4, window_bounds = array<i64: 8, 4>}, {transform_indices = @transform_5, window_bounds = array<i64: 1, 8, 4>}]} {
    %c0 = arith.constant 0 : index
    %c0_0 = arith.constant 0 : index
    %0 = vector.load %arg1[%c0, %c0_0] : memref<4x32xf32, #tpu.memory_space<vmem>>, vector<4x32xf32>
    %c0_1 = arith.constant 0 : index
    %c0_2 = arith.constant 0 : index
    %1 = vector.load %arg2[%c0_1, %c0_2] : memref<1x32xf32, #tpu.memory_space<vmem>>, vector<1x32xf32>
    %c0_3 = arith.constant 0 : index
    %c0_4 = arith.constant 0 : index
    %2 = vector.load %arg3[%c0_3, %c0_4] : memref<8x4xf32, #tpu.memory_space<vmem>>, vector<8x4xf32>
    %cst = arith.constant dense<0.000000e+00> : vector<8x32xf32>
    %3 = tpu.matmul %2, %0, %cst {dimension_numbers = #tpu.dot_dimension_numbers<[1], [0], [0], [1], [0, 0, 1, 1], [], []>} : vector<8x4xf32>, vector<4x32xf32>, vector<8x32xf32> -> vector<8x32xf32>
    %c0_5 = arith.constant 0 : index
    %c0_6 = arith.constant 0 : index
    %4 = vector.load %arg4[%c0_5, %c0_6] : memref<8x4xf32, #tpu.memory_space<vmem>>, vector<8x4xf32>
    %cst_7 = arith.constant dense<0.000000e+00> : vector<8x32xf32>
    %5 = tpu.matmul %4, %0, %cst_7 {dimension_numbers = #tpu.dot_dimension_numbers<[1], [0], [0], [1], [0, 0, 1, 1], [], []>} : vector<8x4xf32>, vector<4x32xf32>, vector<8x32xf32> -> vector<8x32xf32>
    %c0_8 = arith.constant 0 : index
    %c0_9 = arith.constant 0 : index
    %6 = vector.load %arg5[%c0_8, %c0_9] : memref<8x4xf32, #tpu.memory_space<vmem>>, vector<8x4xf32>
    %cst_10 = arith.constant dense<0.000000e+00> : vector<8x32xf32>
    %7 = tpu.matmul %6, %0, %cst_10 {dimension_numbers = #tpu.dot_dimension_numbers<[1], [0], [0], [1], [0, 0, 1, 1], [], []>} : vector<8x4xf32>, vector<4x32xf32>, vector<8x32xf32> -> vector<8x32xf32>
    %c31_i32 = arith.constant 31 : i32
    %8 = tpu.dynamic_rotate %7 by %c31_i32 dim 1 : vector<8x32xf32>, i32 -> vector<8x32xf32>
    %9 = arith.addf %5, %8 : vector<8x32xf32>
    %10 = vector.broadcast %1 : vector<1x32xf32> to vector<8x32xf32>
    %11 = arith.mulf %9, %10 : vector<8x32xf32>
    %cst_11 = arith.constant dense<0.000000e+00> : vector<8xf32>
    %12 = vector.multi_reduction <add>, %3, %cst_11 [1] : vector<8x32xf32> to vector<8xf32>
    %13 = vector.shape_cast %12 : vector<8xf32> to vector<8x1xf32>
    %14 = arith.mulf %3, %3 : vector<8x32xf32>
    %cst_12 = arith.constant dense<0.000000e+00> : vector<8xf32>
    %15 = vector.multi_reduction <add>, %14, %cst_12 [1] : vector<8x32xf32> to vector<8xf32>
    %16 = vector.shape_cast %15 : vector<8xf32> to vector<8x1xf32>
    %cst_13 = arith.constant dense<0.000000e+00> : vector<8xf32>
    %17 = vector.multi_reduction <add>, %11, %cst_13 [1] : vector<8x32xf32> to vector<8xf32>
    %18 = vector.shape_cast %17 : vector<8xf32> to vector<8x1xf32>
    %19 = arith.mulf %11, %11 : vector<8x32xf32>
    %cst_14 = arith.constant dense<0.000000e+00> : vector<8xf32>
    %20 = vector.multi_reduction <add>, %19, %cst_14 [1] : vector<8x32xf32> to vector<8xf32>
    %21 = vector.shape_cast %20 : vector<8xf32> to vector<8x1xf32>
    %22 = tpu.concatenate %13, %16, %18, %21 in 1 : vector<8x1xf32>, vector<8x1xf32>, vector<8x1xf32>, vector<8x1xf32> -> vector<8x4xf32>
    %c0_15 = arith.constant 0 : index
    %c0_16 = arith.constant 0 : index
    %c0_17 = arith.constant 0 : index
    %23 = vector.load %arg6[%c0_15, %c0_16, %c0_17] : memref<1x8x4xf32, #tpu.memory_space<vmem>>, vector<1x8x4xf32>
    %24 = vector.shape_cast %23 : vector<1x8x4xf32> to vector<8x4xf32>
    %25 = vector.shape_cast %22 : vector<8x4xf32> to vector<1x8x4xf32>
    tpu.vector_store %arg6[%c0_15, %c0_16, %c0_17], %25 {strides = array<i32>} : memref<1x8x4xf32, #tpu.memory_space<vmem>>, vector<1x8x4xf32>,
    return
  }
  func.func @transform_0(%arg0: i32) -> (i32, i32) {
    %c0_i32 = arith.constant 0 : i32
    %c0_i32_0 = arith.constant 0 : i32
    return %c0_i32, %arg0 : i32, i32
  }
  func.func @transform_1(%arg0: i32) -> (i32, i32) {
    %c0_i32 = arith.constant 0 : i32
    %c0_i32_0 = arith.constant 0 : i32
    return %c0_i32, %arg0 : i32, i32
  }
  func.func @transform_2(%arg0: i32) -> (i32, i32) {
    %c0_i32 = arith.constant 0 : i32
    %c0_i32_0 = arith.constant 0 : i32
    %c0_i32_1 = arith.constant 0 : i32
    return %c0_i32, %c0_i32_0 : i32, i32
  }
  func.func @transform_3(%arg0: i32) -> (i32, i32) {
    %c0_i32 = arith.constant 0 : i32
    %c0_i32_0 = arith.constant 0 : i32
    %c0_i32_1 = arith.constant 0 : i32
    return %c0_i32, %c0_i32_0 : i32, i32
  }
  func.func @transform_4(%arg0: i32) -> (i32, i32) {
    %c0_i32 = arith.constant 0 : i32
    %c0_i32_0 = arith.constant 0 : i32
    %c0_i32_1 = arith.constant 0 : i32
    return %c0_i32, %c0_i32_0 : i32, i32
  }
  func.func @transform_5(%arg0: i32) -> (i32, i32, i32) {
    %c0_i32 = arith.constant 0 : i32
    %c0_i32_0 = arith.constant 0 : i32
    %c0_i32_1 = arith.constant 0 : i32
    return %arg0, %c0_i32, %c0_i32_0 : i32, i32, i32
  }
}

</mosaic_0001>

<bundles_post_ra>
// kernel: tpu_custom_call.1
= control target key start
LH: loop header
LB: loop body
LE: loop exit
PB: predicated region body
PF: predicated region fallthrough
CT: control target
= control target key end

     0   :  { %vm27_vm0 = vcmask 1043456   ;;  %vm23_vm1 = vcmask 31744   ;;  %v325_v0 = vmov 0.0   ;;  %vm326_vm2 = vmmov 0   ;;  %s327_s24 = smov 32   ;;  %s388_s0 = inlined_call_operand.vmem [shape: f32[4,32], index: 0, kind: input, shape index: {}]   ;;  %s389_s4 = inlined_call_operand.vmem [shape: f32[8,4], index: 4, kind: input, shape index: {}]   ;;  %s390_s2 = inlined_call_operand.vmem [shape: f32[8,4], index: 2, kind: input, shape index: {}]   ;;  %s391_s3 = inlined_call_operand.vmem [shape: f32[8,4], index: 3, kind: input, shape index: {}]   ;;  %s392_s1 = inlined_call_operand.vmem [shape: f32[1,32], index: 1, kind: input, shape index: {}]   ;;  %s393_s5 = inlined_call_operand.vmem [shape: f32[1,8,4], index: 5, kind: output, shape index: {}]  }
   0x1   :  { %311 = vmatprep.subr.mxu1 %v325_v0  ;;  %v20_v1 = vld [vmem:[%s388_s0] sm:$0xf]  ;;  %313 = vmatprep.mubr.msk.f32.mxu1 %vm326_vm2, %v325_v0  ;;  %vm176_vm3 = vcmask 1047808   ;;  %vm267_vm4 = vcmask 261120   ;;  %vm282_vm5 = vcmask 7168   ;;  %vm284_vm6 = vcmask 15360  }
   0x2   :  { %v102_v2 = vld [vmem:[%s389_s4] sm:$0xff]  ;;  %312 = vmatpush3.msk.msra.mxu1 %vm27_vm0, %v20_v1  ;;  %306 = vmatprep.subr.mxu0 %v325_v0  ;;  %vm286_vm7 = vcmask 23552  }
   0x3   :  { %314 = vmatmul.mubr.msk.f32.vlgmr.msra.gmra.mrb[0].mxu1 %vm23_vm1, %v102_v2  ;;  %307 = vmatpush3.msk.msra.mxu0 %vm27_vm0, %v20_v1  ;;  %v22_v3 = vld [vmem:[%s390_s2] sm:$0xff]  ;;  %s328_s2 = smov 127  }
   0x4   :  { %308 = vmatprep.mubr.msk.f32.mxu0 %vm326_vm2, %v325_v0  ;;  %316 = vmatprep.subr.mxu0 %v325_v0  ;;  %v101_v4 = vld [vmem:[%s391_s3] sm:$0xff] }
   0x5   :  { %309 = vmatmul.mubr.msk.f32.vlgmr.msra.gmra.mrb[0].mxu0 %vm23_vm1, %v22_v3  ;;  %v299_v19 = vld [vmem:[%s392_s1] ss:$0 sm:$0xff] }
   0x6   :  { %317 = vmatpush3.msk.msra.mxu0 %vm27_vm0, %v20_v1  ;;  %318 = vmatprep.mubr.msk.f32.mxu0 %vm326_vm2, %v325_v0 }
   0x9   :  { %319 = vmatmul.mubr.msk.f32.vlgmr.msra.gmra.mrb[2].mxu0 %vm23_vm1, %v101_v4 }
  0xd6   :  { %v172_v5 = vpop.f32.mrb[0].mxu1 }
  0xd7   :  { %177 = vrot.lane.b32.xlu0 %v172_v5, %s327_s24  ;;  %v315_v6 = vpop.f32.mrb[1].mxu1 }
  0xd8   :  { %v97_v9 = vpop.f32.mrb[0].mxu0 }
  0xd9   :  { %v271_v10 = vmul.f32 %v97_v9, %v97_v9  ;;  %v310_v11 = vpop.f32.mrb[1].mxu0  ;;  %v268_v17 = vsel %vm267_vm4, %v97_v9, 0.0 }
  0xdb   :  { %v272_v12 = vsel %vm267_vm4, %v271_v10, 0.0 }
  0xdc   :  { %v256_v13 = vpop.f32.mrb[2].mxu0 }
  0xdd   :  { %v320_v14 = vpop.f32.mrb[3].mxu0 }
 0x149   :  { %v178_v7 = vpop.permute.xlu0 %177 }
 0x14a   :  { %v179_v8 = vsel %vm176_vm3, %v178_v7, %v172_v5 }
 0x14b   :  { %180 = vrot.lane.b32.xlu0 %v179_v8, %s327_s24 }
 0x16a   :  { %273 = vadd.xlane.f32.xlu0 %v272_v12 }
 0x1bd   :  { %v181_v15 = vpop.permute.xlu0 %180 }
 0x1be   :  { %v182_v16 = vsel %vm176_vm3, %v181_v15, %v172_v5 }
 0x1bf   :  { %184 = vrot.lane.b32.xlu1 %v182_v16, %s328_s2 }
 0x1e3   :  { %269 = vadd.xlane.f32.xlu1 %v268_v17 }
 0x1f7   :  { %v274_v25 = vpop.xlane.xlu0 %273 }
 0x231   :  { %v185_v18 = vpop.permute.xlu1 %184 }
 0x232   :  { %v257_v20 = vadd.f32 %v256_v13, %v185_v18 }
 0x234   :  { %v266_v21 = vmul.f32 %v299_v19, %v257_v20 }
 0x236   :  { %v275_v22 = vsel %vm267_vm4, %v266_v21, 0.0  ;;  %v278_v23 = vmul.f32 %v266_v21, %v266_v21 }
 0x237   :  { %276 = vadd.xlane.f32.xlu0 %v275_v22 }
 0x238   :  { %v279_v24 = vsel %vm267_vm4, %v278_v23, 0.0 }
 0x239   :  { %280 = vadd.xlane.f32.xlu1 %v279_v24 }
 0x270   :  { %v270_v26 = vpop.xlane.xlu1 %269 }
 0x271   :  { %v283_v27 = vsel %vm282_vm5, %v270_v26, %v274_v25 }
 0x2c4   :  { %v277_v28 = vpop.xlane.xlu0 %276 }
 0x2c5   :  { %v285_v29 = vsel %vm284_vm6, %v283_v27, %v277_v28 }
 0x2c6   :  { %v281_v30 = vpop.xlane.xlu1 %280 }
 0x2c7   :  { %v287_v31 = vsel %vm286_vm7, %v285_v29, %v281_v30 }
 0x2c8   :  { %288 = vst.msk [vmem:[%s393_s5] sm:$0xff] %vm23_vm1, %v287_v31 }

</bundles_post_ra>
